<compile_context>
chip_gen: v7x
topology: tpu7x:2x2x1
jax: 0.10.0
libtpu: 0.0.40
codegen_flags: <defaults>
</compile_context>

<pallas_src>
import functools

import jax
import jax.numpy as jnp
from jax.experimental import pallas as pl
from jax.experimental.pallas import tpu as pltpu


def _round_up(x, m):
    return ((x + m - 1) // m) * m


def _pick_tile_m(n, target):
    # Largest row tile <= target that is a multiple of the f32 sublane tile (8).
    return max(8, min(target, _round_up(n, 8)))


# --------------------------------------------------------------------------------------
# Dense / Jumping  +  aggregation == "concat":   concat(Xs, -1) @ W.T + b
# --------------------------------------------------------------------------------------

def _dense_concat_kernel(*refs, num_layers):
    x_refs = refs[:num_layers]                     # each (tm, D)
    wT_ref, b_ref, o_ref = refs[num_layers:]       # (L, D, out), (1, out), (tm, out)
    acc = jnp.dot(x_refs[0][...], wT_ref[0], preferred_element_type=jnp.float32)
    for l in range(1, num_layers):
        acc = acc + jnp.dot(x_refs[l][...], wT_ref[l],
                            preferred_element_type=jnp.float32)
    o_ref[...] = (acc + b_ref[...]).astype(o_ref.dtype)


def dense_concat_linear(xs, wT, b, *, tm_target=256):
    L = len(xs)
    assert wT.shape[0] == L
    N, D = xs[0].shape
    out_dim = wT.shape[-1]
    tm = _pick_tile_m(N, tm_target)
    in_specs = [pl.BlockSpec((tm, D), lambda i: (i, 0)) for _ in range(L)]
    in_specs += [
        pl.BlockSpec((L, D, out_dim), lambda i: (0, 0, 0)),   # weight resident in VMEM
        pl.BlockSpec((1, out_dim), lambda i: (0, 0)),
    ]
    return pl.pallas_call(
        functools.partial(_dense_concat_kernel, num_layers=L),
        out_shape=jax.ShapeDtypeStruct((N, out_dim), xs[0].dtype),
        grid_spec=pltpu.PrefetchScalarGridSpec(
            num_scalar_prefetch=0,
            grid=(pl.cdiv(N, tm),),
            in_specs=in_specs,
            out_specs=pl.BlockSpec((tm, out_dim), lambda i: (i, 0)),
        ),
        compiler_params=pltpu.CompilerParams(dimension_semantics=("parallel",)),
    )(*xs, wT, b)


# --------------------------------------------------------------------------------------
# aggregation == "maxpool":  elementwise max over the layer list
# --------------------------------------------------------------------------------------

def _maxpool_kernel(*refs, num_layers):
    x_refs = refs[:num_layers]
    o_ref = refs[num_layers]
    m = x_refs[0][...]
    for l in range(1, num_layers):
        m = jnp.maximum(m, x_refs[l][...])
    o_ref[...] = m


def maxpool_agg(xs, *, tm_target=512):
    L = len(xs)
    N, D = xs[0].shape
    tm = _pick_tile_m(N, tm_target)
    return pl.pallas_call(
        functools.partial(_maxpool_kernel, num_layers=L),
        out_shape=jax.ShapeDtypeStruct((N, D), xs[0].dtype),
        grid_spec=pltpu.PrefetchScalarGridSpec(
            num_scalar_prefetch=0,
            grid=(pl.cdiv(N, tm),),
            in_specs=[pl.BlockSpec((tm, D), lambda i: (i, 0)) for _ in range(L)],
            out_specs=pl.BlockSpec((tm, D), lambda i: (i, 0)),
        ),
        compiler_params=pltpu.CompilerParams(dimension_semantics=("parallel",)),
    )(*xs)


# --------------------------------------------------------------------------------------
# aggregation == "attention":  out = sum_l sigmoid(x_l @ w + b) * x_l
# --------------------------------------------------------------------------------------

def _attention_kernel(*refs, num_layers):
    x_refs = refs[:num_layers]
    w_ref, b_ref, o_ref = refs[num_layers:]        # (D, 1), (1, 1), (tm, D)
    w = w_ref[...]
    b = b_ref[...]
    acc = None
    for l in range(num_layers):
        x = x_refs[l][...].astype(jnp.float32)
        # Skinny MXU matmul for the logit (keeps the VPU/XLU slots free).
        logit = jnp.dot(x, w, preferred_element_type=jnp.float32) + b   # (tm, 1)
        contrib = jax.nn.sigmoid(logit) * x
        acc = contrib if acc is None else acc + contrib
    o_ref[...] = acc.astype(o_ref.dtype)


def attention_agg(xs, w_att, b_att, *, tm_target=512):
    L = len(xs)
    N, D = xs[0].shape
    tm = _pick_tile_m(N, tm_target)
    in_specs = [pl.BlockSpec((tm, D), lambda i: (i, 0)) for _ in range(L)]
    in_specs += [
        pl.BlockSpec((D, 1), lambda i: (0, 0)),
        pl.BlockSpec((1, 1), lambda i: (0, 0)),
    ]
    return pl.pallas_call(
        functools.partial(_attention_kernel, num_layers=L),
        out_shape=jax.ShapeDtypeStruct((N, D), xs[0].dtype),
        grid_spec=pltpu.PrefetchScalarGridSpec(
            num_scalar_prefetch=0,
            grid=(pl.cdiv(N, tm),),
            in_specs=in_specs,
            out_specs=pl.BlockSpec((tm, D), lambda i: (i, 0)),
        ),
        compiler_params=pltpu.CompilerParams(dimension_semantics=("parallel",)),
    )(*xs, w_att, b_att)


# --------------------------------------------------------------------------------------
# Residual / Initial:  ca * a + cb * b   (tiled elementwise)
# --------------------------------------------------------------------------------------

def _mix_kernel(a_ref, b_ref, o_ref, *, ca, cb):
    o_ref[...] = (ca * a_ref[...].astype(jnp.float32)
                  + cb * b_ref[...].astype(jnp.float32)).astype(o_ref.dtype)


def mix(a, b, ca, cb, *, tm_target=512):
    # TODO(synk): standalone add/mix could be left to XLA fusion with the producer;
    # kept as a tiled Pallas kernel here to cover the skip-connection paths explicitly.
    N, D = a.shape
    tm = _pick_tile_m(N, tm_target)
    return pl.pallas_call(
        functools.partial(_mix_kernel, ca=float(ca), cb=float(cb)),
        out_shape=jax.ShapeDtypeStruct((N, D), a.dtype),
        grid_spec=pltpu.PrefetchScalarGridSpec(
            num_scalar_prefetch=0,
            grid=(pl.cdiv(N, tm),),
            in_specs=[pl.BlockSpec((tm, D), lambda i: (i, 0)),
                      pl.BlockSpec((tm, D), lambda i: (i, 0))],
            out_specs=pl.BlockSpec((tm, D), lambda i: (i, 0)),
        ),
        compiler_params=pltpu.CompilerParams(dimension_semantics=("parallel",)),
    )(a, b)


# --------------------------------------------------------------------------------------
# Module wrapper
# --------------------------------------------------------------------------------------

class SkipConnectionLayer:
    def __init__(self, skip_type, embed_dim=128, layers=0, aggregation="concat",
                 key=None):
        self.skip_type = skip_type
        self.embed_dim = embed_dim
        self.layers = layers
        self.aggregation = aggregation
        self.alpha = 0.5  # ResidualConnection / InitialConnection default
        self.params = {}
        if key is None:
            key = jax.random.PRNGKey(0)

        if skip_type in ("Dense", "Jumping"):
            k1, k2 = jax.random.split(key)
            if aggregation == "concat":
                in_dim = layers * embed_dim
                out_dim = embed_dim
                bound = 1.0 / float(in_dim) ** 0.5
                W = jax.random.uniform(k1, (out_dim, in_dim), jnp.float32, -bound, bound)
                b = jax.random.uniform(k2, (out_dim,), jnp.float32, -bound, bound)
                # Pre-split the transposed weight into per-layer (D, out_dim) slabs so the
                # kernel can consume the layer list without an HBM concatenate.
                self.params = {
                    "wT": W.T.reshape(layers, embed_dim, out_dim),
                    "b": b.reshape(1, out_dim),
                }
            elif aggregation == "attention":
                # TODO(synk): the original __init__ sizes Linear(layers*embed_dim, 1), which
                # only matches the stacked (N, L, embed_dim) input when layers == 1; we size
                # the attention weight by embed_dim so the forward math is well defined.
                bound = 1.0 / float(embed_dim) ** 0.5
                w = jax.random.uniform(k1, (embed_dim, 1), jnp.float32, -bound, bound)
                b = jax.random.uniform(k2, (1, 1), jnp.float32, -bound, bound)
                self.params = {"w_att": w, "b_att": b}

    def __call__(self, Xs):
        assert len(Xs) >= 1
        st = self.skip_type

        if st == "None" or st is None:
            return Xs[-1], Xs

        if st == "Residual":
            Xs = list(Xs)
            if len(Xs) % 2 == 1 and len(Xs) > 2:
                Xs[-1] = mix(Xs[-1], Xs[-3], 1.0, 1.0)
            return Xs[-1], Xs

        if st == "Initial":
            Xs = list(Xs)
            if len(Xs) > 2:
                Xs[-1] = mix(Xs[-1], Xs[1], 1.0 - self.alpha, self.alpha)
            return Xs[-1], Xs

        if st in ("Dense", "Jumping"):
            if self.aggregation == "concat":
                X = dense_concat_linear(list(Xs), self.params["wT"], self.params["b"])
                return X, Xs
            if self.aggregation == "maxpool":
                X = maxpool_agg(list(Xs))
                return X, Xs
            if self.aggregation == "attention":
                X = attention_agg(list(Xs), self.params["w_att"], self.params["b_att"])
                return X, Xs
            raise Exception("Unknown aggregation")

        raise Exception("Unknown skip type")


# --------------------------------------------------------------------------------------
# Demo / correctness check
# --------------------------------------------------------------------------------------

if __name__ == "__main__":
    key = jax.random.PRNGKey(0)
    N, D, L = 256, 128, 4
    keys = jax.random.split(key, L + 3)
    Xs = [jax.random.normal(keys[i], (N, D), jnp.float32) for i in range(L)]

    # --- Dense + concat (MXU kernel, concat folded into per-layer matmuls) ---
    layer = SkipConnectionLayer("Dense", embed_dim=D, layers=L, aggregation="concat",
                                key=keys[L])
    X, _ = layer(Xs)
    jax.block_until_ready(X)
    wT_flat = layer.params["wT"].reshape(L * D, D)
    ref = jnp.concatenate(Xs, axis=-1) @ wT_flat + layer.params["b"]
    assert jnp.allclose(X, ref, atol=2e-3, rtol=1e-3), "dense concat mismatch"

    # --- Dense + concat with N not a multiple of the tile (partial-tile handling) ---
    N2 = 200
    Xs2 = [jax.random.normal(keys[L + 1] + i, (N2, D), jnp.float32) for i in range(L)]
    X2, _ = layer(Xs2)
    ref2 = jnp.concatenate(Xs2, axis=-1) @ wT_flat + layer.params["b"]
    assert jnp.allclose(X2, ref2, atol=2e-3, rtol=1e-3), "dense concat (partial tile) mismatch"

    # --- Jumping + maxpool ---
    layer_mp = SkipConnectionLayer("Jumping", embed_dim=D, layers=L, aggregation="maxpool")
    Xmp, _ = layer_mp(Xs)
    assert jnp.allclose(Xmp, jnp.max(jnp.stack(Xs, axis=-1), axis=-1), atol=1e-6)

    # --- Dense + attention ---
    layer_att = SkipConnectionLayer("Dense", embed_dim=D, layers=L, aggregation="attention",
                                    key=keys[L])
    Xatt, _ = layer_att(Xs)
    pps = jnp.stack(Xs, axis=1)
    sc = jax.nn.sigmoid(
        jnp.einsum("nld,d->nl", pps, layer_att.params["w_att"][:, 0])
        + layer_att.params["b_att"][0, 0]
    )
    assert jnp.allclose(Xatt, jnp.einsum("nl,nld->nd", sc, pps), atol=2e-3, rtol=1e-3)

    # --- Residual (needs odd-length list > 2 to trigger the add) ---
    Xs5 = Xs + [jax.random.normal(keys[L + 2], (N, D), jnp.float32)]
    Xr, _ = SkipConnectionLayer("Residual")(list(Xs5))
    assert jnp.allclose(Xr, Xs5[-1] + Xs5[-3], atol=1e-5)

    # --- Initial ---
    Xi, _ = SkipConnectionLayer("Initial")(list(Xs5))
    assert jnp.allclose(Xi, 0.5 * Xs5[-1] + 0.5 * Xs5[1], atol=1e-5)

    # --- None ---
    Xn, _ = SkipConnectionLayer("None")(Xs)
    assert jnp.allclose(Xn, Xs[-1])

    jax.block_until_ready((X, X2, Xmp, Xatt, Xr, Xi, Xn))
    print("KERNEL_OK")
</pallas_src>

<mosaic_0001>
module attributes {stable_mosaic.version = 11 : i64} {
  func.func @_dense_concat_kernel(%arg0: i32, %arg1: memref<256x128xf32, #tpu.memory_space<vmem>>, %arg2: memref<256x128xf32, #tpu.memory_space<vmem>>, %arg3: memref<256x128xf32, #tpu.memory_space<vmem>>, %arg4: memref<256x128xf32, #tpu.memory_space<vmem>>, %arg5: memref<4x128x128xf32, #tpu.memory_space<vmem>>, %arg6: memref<1x128xf32, #tpu.memory_space<vmem>>, %arg7: memref<256x128xf32, #tpu.memory_space<vmem>>) attributes {dimension_semantics = [#tpu.dimension_semantics<parallel>], iteration_bounds = array<i64: 1>, scalar_prefetch = 0 : i64, scratch_operands = 0 : i64, tpu.core_type = #tpu.core_type<tc>, window_params = [{transform_indices = @transform_0, window_bounds = array<i64: 256, 128>}, {transform_indices = @transform_1, window_bounds = array<i64: 256, 128>}, {transform_indices = @transform_2, window_bounds = array<i64: 256, 128>}, {transform_indices = @transform_3, window_bounds = array<i64: 256, 128>}, {pipeline_mode = #tpu.pipeline_mode<synchronous>, transform_indices = @transform_4, window_bounds = array<i64: 4, 128, 128>}, {pipeline_mode = #tpu.pipeline_mode<synchronous>, transform_indices = @transform_5, window_bounds = array<i64: 1, 128>}, {transform_indices = @transform_6, window_bounds = array<i64: 256, 128>}]} {
    %c0 = arith.constant 0 : index
    %c0_0 = arith.constant 0 : index
    %0 = vector.load %arg1[%c0, %c0_0] : memref<256x128xf32, #tpu.memory_space<vmem>>, vector<256x128xf32>
    %c0_1 = arith.constant 0 : index
    %c0_2 = arith.constant 0 : index
    %c0_3 = arith.constant 0 : index
    %1 = vector.load %arg5[%c0_1, %c0_2, %c0_3] : memref<4x128x128xf32, #tpu.memory_space<vmem>>, vector<1x128x128xf32>
    %2 = vector.shape_cast %1 : vector<1x128x128xf32> to vector<128x128xf32>
    %cst = arith.constant dense<0.000000e+00> : vector<256x128xf32>
    %3 = tpu.matmul %0, %2, %cst {dimension_numbers = #tpu.dot_dimension_numbers<[1], [0], [0], [1], [0, 0, 1, 1], [], []>} : vector<256x128xf32>, vector<128x128xf32>, vector<256x128xf32> -> vector<256x128xf32>
    %c0_4 = arith.constant 0 : index
    %c0_5 = arith.constant 0 : index
    %4 = vector.load %arg2[%c0_4, %c0_5] : memref<256x128xf32, #tpu.memory_space<vmem>>, vector<256x128xf32>
    %c1 = arith.constant 1 : index
    %c0_6 = arith.constant 0 : index
    %c0_7 = arith.constant 0 : index
    %5 = vector.load %arg5[%c1, %c0_6, %c0_7] : memref<4x128x128xf32, #tpu.memory_space<vmem>>, vector<1x128x128xf32>
    %6 = vector.shape_cast %5 : vector<1x128x128xf32> to vector<128x128xf32>
    %cst_8 = arith.constant dense<0.000000e+00> : vector<256x128xf32>
    %7 = tpu.matmul %4, %6, %cst_8 {dimension_numbers = #tpu.dot_dimension_numbers<[1], [0], [0], [1], [0, 0, 1, 1], [], []>} : vector<256x128xf32>, vector<128x128xf32>, vector<256x128xf32> -> vector<256x128xf32>
    %8 = arith.addf %3, %7 : vector<256x128xf32>
    %c0_9 = arith.constant 0 : index
    %c0_10 = arith.constant 0 : index
    %9 = vector.load %arg3[%c0_9, %c0_10] : memref<256x128xf32, #tpu.memory_space<vmem>>, vector<256x128xf32>
    %c2 = arith.constant 2 : index
    %c0_11 = arith.constant 0 : index
    %c0_12 = arith.constant 0 : index
    %10 = vector.load %arg5[%c2, %c0_11, %c0_12] : memref<4x128x128xf32, #tpu.memory_space<vmem>>, vector<1x128x128xf32>
    %11 = vector.shape_cast %10 : vector<1x128x128xf32> to vector<128x128xf32>
    %cst_13 = arith.constant dense<0.000000e+00> : vector<256x128xf32>
    %12 = tpu.matmul %9, %11, %cst_13 {dimension_numbers = #tpu.dot_dimension_numbers<[1], [0], [0], [1], [0, 0, 1, 1], [], []>} : vector<256x128xf32>, vector<128x128xf32>, vector<256x128xf32> -> vector<256x128xf32>
    %13 = arith.addf %8, %12 : vector<256x128xf32>
    %c0_14 = arith.constant 0 : index
    %c0_15 = arith.constant 0 : index
    %14 = vector.load %arg4[%c0_14, %c0_15] : memref<256x128xf32, #tpu.memory_space<vmem>>, vector<256x128xf32>
    %c3 = arith.constant 3 : index
    %c0_16 = arith.constant 0 : index
    %c0_17 = arith.constant 0 : index
    %15 = vector.load %arg5[%c3, %c0_16, %c0_17] : memref<4x128x128xf32, #tpu.memory_space<vmem>>, vector<1x128x128xf32>
    %16 = vector.shape_cast %15 : vector<1x128x128xf32> to vector<128x128xf32>
    %cst_18 = arith.constant dense<0.000000e+00> : vector<256x128xf32>
    %17 = tpu.matmul %14, %16, %cst_18 {dimension_numbers = #tpu.dot_dimension_numbers<[1], [0], [0], [1], [0, 0, 1, 1], [], []>} : vector<256x128xf32>, vector<128x128xf32>, vector<256x128xf32> -> vector<256x128xf32>
    %18 = arith.addf %13, %17 : vector<256x128xf32>
    %c0_19 = arith.constant 0 : index
    %c0_20 = arith.constant 0 : index
    %19 = vector.load %arg6[%c0_19, %c0_20] : memref<1x128xf32, #tpu.memory_space<vmem>>, vector<1x128xf32>
    %20 = vector.broadcast %19 : vector<1x128xf32> to vector<256x128xf32>
    %21 = arith.addf %18, %20 : vector<256x128xf32>
    %c0_21 = arith.constant 0 : index
    %c0_22 = arith.constant 0 : index
    %22 = vector.load %arg7[%c0_21, %c0_22] : memref<256x128xf32, #tpu.memory_space<vmem>>, vector<256x128xf32>
    tpu.vector_store %arg7[%c0_21, %c0_22], %21 {strides = array<i32>} : memref<256x128xf32, #tpu.memory_space<vmem>>, vector<256x128xf32>,
    return
  }
  func.func @transform_0(%arg0: i32) -> (i32, i32) {
    %c0_i32 = arith.constant 0 : i32
    %c0_i32_0 = arith.constant 0 : i32
    return %arg0, %c0_i32 : i32, i32
  }
  func.func @transform_1(%arg0: i32) -> (i32, i32) {
    %c0_i32 = arith.constant 0 : i32
    %c0_i32_0 = arith.constant 0 : i32
    return %arg0, %c0_i32 : i32, i32
  }
  func.func @transform_2(%arg0: i32) -> (i32, i32) {
    %c0_i32 = arith.constant 0 : i32
    %c0_i32_0 = arith.constant 0 : i32
    return %arg0, %c0_i32 : i32, i32
  }
  func.func @transform_3(%arg0: i32) -> (i32, i32) {
    %c0_i32 = arith.constant 0 : i32
    %c0_i32_0 = arith.constant 0 : i32
    return %arg0, %c0_i32 : i32, i32
  }
  func.func @transform_4(%arg0: i32) -> (i32, i32, i32) {
    %c0_i32 = arith.constant 0 : i32
    %c0_i32_0 = arith.constant 0 : i32
    %c0_i32_1 = arith.constant 0 : i32
    %c0_i32_2 = arith.constant 0 : i32
    return %c0_i32, %c0_i32_0, %c0_i32_1 : i32, i32, i32
  }
  func.func @transform_5(%arg0: i32) -> (i32, i32) {
    %c0_i32 = arith.constant 0 : i32
    %c0_i32_0 = arith.constant 0 : i32
    %c0_i32_1 = arith.constant 0 : i32
    return %c0_i32, %c0_i32_0 : i32, i32
  }
  func.func @transform_6(%arg0: i32) -> (i32, i32) {
    %c0_i32 = arith.constant 0 : i32
    %c0_i32_0 = arith.constant 0 : i32
    return %arg0, %c0_i32 : i32, i32
  }
}

</mosaic_0001>

<bundles_post_ra>
// kernel: tpu_custom_call.1
= control target key start
LH: loop header
LB: loop body
LE: loop exit
PB: predicated region body
PF: predicated region fallthrough
CT: control target
= control target key end

     0   :  { %11 = vsyncpa [#allocation3], 0  ;;  %s2410_s0 = inlined_call_operand.hbm [shape: f32[256,128], index: 0, kind: input, shape index: {}]   ;;  %s2411_s1 = inlined_call_operand.hbm [shape: f32[256,128], index: 1, kind: input, shape index: {}]   ;;  %s2412_s2 = inlined_call_operand.hbm [shape: f32[256,128], index: 2, kind: input, shape index: {}]   ;;  %s2413_s3 = inlined_call_operand.hbm [shape: f32[256,128], index: 3, kind: input, shape index: {}]   ;;  %s2414_s4 = inlined_call_operand.hbm [shape: f32[4,128,128], index: 4, kind: input, shape index: {}]   ;;  %s2415_s5 = inlined_call_operand.vmem [shape: f32[1,128], index: 5, kind: input, shape index: {}]   ;;  %s2416_s6 = inlined_call_operand.hbm [shape: f32[256,128], index: 6, kind: output, shape index: {}]  }
   0x1   :  { %12 = vsyncpa [#allocation6], 0 }
   0x2   :  { %13 = vsyncpa [#allocation9], 0 }
   0x3   :  { %14 = vsyncpa [#allocation4], 0  ;;  %s2226_s21 = smov [#allocation5]   ;;  %s2227_s23 = smov [#allocation8]  }
   0x4   :  { %s32_s22 = sshll.u32 %s2226_s21, 4  ;;  %s56_s24 = sshll.u32 %s2227_s23, 4  ;;  %s33_s22 = int_to_ptr.vmem [resolvable:$true] %s32_s22  ;;  %s2269_s24 = int_to_ptr.vmem [resolvable:$true] %s56_s24 }
   0x5   :  { %s2086_s27 = scalar_lea.hbm %s2411_s1, 4096 }
   0x6   :  { %p2087_p0 = scmp.ne.s32.totalorder %s2411_s1, %s2086_s27  ;;  %p2090_p1 = scmp.lt.u32.totalorder %s2086_s27, %s2411_s1 }
   0x8   :  { %p2092_p2 = pnand %p2090_p1, %p2087_p0 }
   0xa   :  { %2095 = shalt.err (!%p2092_p2)
}
   0xb   :  { %s2096_s8 = scalar_lea.vmem %s33_s22, 4096  ;;  %p2101_p4 = scmp.lt.s32.totalorder %s33_s22, %s33_s22 }
   0xc   :  { %p2097_p3 = scmp.ne.s32.totalorder %s33_s22, %s2096_s8  ;;  %p2102_p5 = scmp.lt.s32.totalorder %s2096_s8, %s2096_s8 }
   0xe   :  { %p2103_p6 = por %p2102_p5, %p2101_p4 }
  0x10   :  { %p2104_p7 = pnand %p2103_p6, %p2097_p3 }
  0x12   :  { %2107 = shalt.err (!%p2104_p7)
}
  0x13   :  { %s2228_s9 = smov 128   ;;  %s2229_s10 = smov 8  }
  0x14   :  { %38 = dma.hbm_to_vmem [thread:$0]  %s2411_s1, 4096, %s33_s22, [#allocation6], %s2228_s9, %s2228_s9, %s2229_s10  }
  0x15   :  { %s2108_s15 = scalar_lea.hbm %s2413_s3, 4096 }
  0x16   :  { %p2109_p8 = scmp.ne.s32.totalorder %s2413_s3, %s2108_s15  ;;  %p2112_p9 = scmp.lt.u32.totalorder %s2108_s15, %s2413_s3 }
  0x18   :  { %p2114_p10 = pnand %p2112_p9, %p2109_p8 }
  0x1a   :  { %2117 = shalt.err (!%p2114_p10)
}
  0x1b   :  { %s2118_s20 = scalar_lea.vmem %s2269_s24, 4096  ;;  %p2123_p12 = scmp.lt.s32.totalorder %s2269_s24, %s2269_s24 }
  0x1c   :  { %p2119_p11 = scmp.ne.s32.totalorder %s2269_s24, %s2118_s20  ;;  %p2124_p13 = scmp.lt.s32.totalorder %s2118_s20, %s2118_s20 }
  0x1e   :  { %p2125_p0 = por %p2124_p13, %p2123_p12 }
  0x20   :  { %p2126_p1 = pnand %p2125_p0, %p2119_p11 }
  0x22   :  { %2129 = shalt.err (!%p2126_p1)
}
  0x23   :  { %62 = dma.hbm_to_vmem [thread:$0]  %s2413_s3, 4096, %s2269_s24, [#allocation9], %s2228_s9, %s2228_s9, %s2229_s10  }
  0x24   :  { %s2230_s22 = smov [#allocation2]   ;;  %s2231_s25 = smov [#allocation7]  }
  0x25   :  { %s20_s23 = sshll.u32 %s2230_s22, 4  ;;  %s44_s26 = sshll.u32 %s2231_s25, 4  ;;  %s21_s23 = int_to_ptr.vmem [resolvable:$true] %s20_s23  ;;  %s2306_s26 = int_to_ptr.vmem [resolvable:$true] %s44_s26 }
  0x26   :  { %s2130_s29 = scalar_lea.hbm %s2410_s0, 4096 }
  0x27   :  { %p2131_p2 = scmp.ne.s32.totalorder %s2410_s0, %s2130_s29  ;;  %p2134_p3 = scmp.lt.u32.totalorder %s2130_s29, %s2410_s0 }
  0x29   :  { %p2136_p4 = pnand %p2134_p3, %p2131_p2 }
  0x2b   :  { %2139 = shalt.err (!%p2136_p4)
}
  0x2c   :  { %s2140_s3 = scalar_lea.vmem %s21_s23, 4096  ;;  %p2145_p6 = scmp.lt.s32.totalorder %s21_s23, %s21_s23 }
  0x2d   :  { %p2141_p5 = scmp.ne.s32.totalorder %s21_s23, %s2140_s3  ;;  %p2146_p7 = scmp.lt.s32.totalorder %s2140_s3, %s2140_s3 }
  0x2f   :  { %p2147_p8 = por %p2146_p7, %p2145_p6 }
  0x31   :  { %p2148_p9 = pnand %p2147_p8, %p2141_p5 }
  0x33   :  { %2151 = shalt.err (!%p2148_p9)
}
  0x34   :  { %26 = dma.hbm_to_vmem [thread:$0]  %s2410_s0, 4096, %s21_s23, [#allocation3], %s2228_s9, %s2228_s9, %s2229_s10  }
  0x35   :  { %s2152_s15 = scalar_lea.hbm %s2412_s2, 4096 }
  0x36   :  { %p2153_p10 = scmp.ne.s32.totalorder %s2412_s2, %s2152_s15  ;;  %p2156_p11 = scmp.lt.u32.totalorder %s2152_s15, %s2412_s2 }
  0x38   :  { %p2158_p12 = pnand %p2156_p11, %p2153_p10 }
  0x3a   :  { %2161 = shalt.err (!%p2158_p12)
}
  0x3b   :  { %s2162_s20 = scalar_lea.vmem %s2306_s26, 4096  ;;  %p2167_p0 = scmp.lt.s32.totalorder %s2306_s26, %s2306_s26 }
  0x3c   :  { %p2163_p13 = scmp.ne.s32.totalorder %s2306_s26, %s2162_s20  ;;  %p2168_p1 = scmp.lt.s32.totalorder %s2162_s20, %s2162_s20 }
  0x3e   :  { %p2169_p2 = por %p2168_p1, %p2167_p0 }
  0x40   :  { %p2170_p3 = pnand %p2169_p2, %p2163_p13 }
  0x42   :  { %2173 = shalt.err (!%p2170_p3)
}
  0x43   :  { %50 = dma.hbm_to_vmem [thread:$0]  %s2412_s2, 4096, %s2306_s26, [#allocation6], %s2228_s9, %s2228_s9, %s2229_s10  }
  0x44   :  { %s2232_s21 = smov [#allocation10]   ;;  %s2174_s27 = scalar_lea.hbm %s2414_s4, 8192 }
  0x45   :  { %s68_s22 = sshll.u32 %s2232_s21, 4  ;;  %p2175_p4 = scmp.ne.s32.totalorder %s2414_s4, %s2174_s27  ;;  %s69_s22 = int_to_ptr.vmem [resolvable:$true] %s68_s22 }
  0x46   :  { %p2178_p5 = scmp.lt.u32.totalorder %s2174_s27, %s2414_s4 }
  0x48   :  { %p2180_p6 = pnand %p2178_p5, %p2175_p4 }
  0x4a   :  { %2183 = shalt.err (!%p2180_p6)
}
  0x4b   :  { %s2184_s8 = scalar_lea.vmem %s69_s22, 8192  ;;  %p2189_p8 = scmp.lt.s32.totalorder %s69_s22, %s69_s22 }
  0x4c   :  { %p2185_p7 = scmp.ne.s32.totalorder %s69_s22, %s2184_s8  ;;  %p2190_p9 = scmp.lt.s32.totalorder %s2184_s8, %s2184_s8 }
  0x4e   :  { %p2191_p10 = por %p2190_p9, %p2189_p8 }
  0x50   :  { %p2192_p11 = pnand %p2191_p10, %p2185_p7 }
  0x52   :  { %2195 = shalt.err (!%p2192_p11)
}
  0x53   :  { %74 = dma.hbm_to_vmem [thread:$0]  %s2414_s4, 8192, %s69_s22, [#allocation9], %s2228_s9, %s2228_s9, %s2229_s10  }
  0x54   :  { %2218 = dma.done.wait [#allocation3], 4096  }
  0x55   :  { %2219 = vsyncadd [#allocation3], 4294963200 }
  0x56   :  { %2220 = dma.done.wait [#allocation6], 8192  }
  0x57   :  { %2221 = vsyncadd [#allocation6], 4294959104 }
  0x58   :  { %2222 = dma.done.wait [#allocation9], 12288  }
  0x59   :  { %2223 = vsyncadd [#allocation9], 4294955008  ;;  %v173_v0 = vld [vmem:[#allocation10 + $0x80] sm:$0xff]  ;;  %v174_v1 = vld [vmem:[#allocation10 + $0x88] sm:$0xff] }
  0x5a   :  { %v672_v2 = vld [vmem:[#allocation10 + $0x100] sm:$0xff]  ;;  %v1854_v3 = vpack.c.bf16 %v174_v1, %v173_v0  ;;  %v673_v4 = vld [vmem:[#allocation10 + $0x108] sm:$0xff]  ;;  %v175_v5 = vld [vmem:[#allocation10 + $0x90] sm:$0xff] }
  0x5b   :  { %v176_v6 = vld [vmem:[#allocation10 + $0x98] sm:$0xff]  ;;  %v1918_v7 = vpack.c.bf16 %v673_v4, %v672_v2  ;;  %v674_v9 = vld [vmem:[#allocation10 + $0x110] sm:$0xff]  ;;  %v177_v11 = vld [vmem:[#allocation10 + $0xa0] sm:$0xff] }
  0x5c   :  { %v1858_v8 = vpack.c.bf16 %v176_v6, %v175_v5  ;;  %v675_v10 = vld [vmem:[#allocation10 + $0x118] sm:$0xff]  ;;  %1855 = vmatprep.subr.bf16.mxu1 %v1854_v3  ;;  %v178_v13 = vld [vmem:[#allocation10 + $0xa8] sm:$0xff]  ;;  %v676_v14 = vld [vmem:[#allocation10 + $0x120] sm:$0xff] }
  0x5d   :  { %v1922_v12 = vpack.c.bf16 %v675_v10, %v674_v9  ;;  %v677_v15 = vld [vmem:[#allocation10 + $0x128] sm:$0xff]  ;;  %1919 = vmatprep.subr.bf16.mxu0 %v1918_v7  ;;  %1857 = vmatpush3.bf16.msra.mxu1 %v1854_v3  ;;  %v1862_v16 = vpack.c.bf16 %v178_v13, %v177_v11  ;;  %v179_v18 = vld [vmem:[#allocation10 + $0xb0] sm:$0xff]  ;;  %v180_v19 = vld [vmem:[#allocation10 + $0xb8] sm:$0xff] }
  0x5e   :  { %1921 = vmatpush3.bf16.msra.mxu0 %v1918_v7  ;;  %1859 = vmatprep.subr.bf16.mxu1 %v1858_v8  ;;  %v1926_v17 = vpack.c.bf16 %v677_v15, %v676_v14  ;;  %v678_v20 = vld [vmem:[#allocation10 + $0x130] sm:$0xff]  ;;  %v679_v21 = vld [vmem:[#allocation10 + $0x138] sm:$0xff]  ;;  %v1866_v22 = vpack.c.bf16 %v180_v19, %v179_v18  ;;  %v181_v24 = vld [vmem:[#allocation10 + $0xc0] sm:$0xff] }
  0x5f   :  { %1923 = vmatprep.subr.bf16.mxu0 %v1922_v12  ;;  %v1930_v23 = vpack.c.bf16 %v679_v21, %v678_v20  ;;  %v182_v25 = vld [vmem:[#allocation10 + $0xc8] sm:$0xff]  ;;  %v140_v26 = vld [vmem:[#allocation5] sm:$0xff]  ;;  %v183_v32 = vld [vmem:[#allocation10 + $0xd0] sm:$0xff] }
  0x60   :  { %v680_v27 = vld [vmem:[#allocation10 + $0x140] sm:$0xff]  ;;  %v681_v28 = vld [vmem:[#allocation10 + $0x148] sm:$0xff]  ;;  %1566 = vmatprep.mubr.f32.mxu1 %v140_v26  ;;  %v1870_v30 = vpack.c.bf16 %v182_v25, %v181_v24  ;;  %v184_v33 = vld [vmem:[#allocation10 + $0xd8] sm:$0xff] }
  0x61   :  { %1861 = vmatpush3.bf16.msra.mxu1 %v1858_v8  ;;  %v639_v29 = vld [vmem:[#allocation7] sm:$0xff]  ;;  %v1934_v31 = vpack.c.bf16 %v681_v28, %v680_v27  ;;  %v682_v34 = vld [vmem:[#allocation10 + $0x150] sm:$0xff]  ;;  %v683_v35 = vld [vmem:[#allocation10 + $0x158] sm:$0xff]  ;;  %v1874_v36 = vpack.c.bf16 %v184_v33, %v183_v32 }
  0x62   :  { %1925 = vmatpush3.bf16.msra.mxu0 %v1922_v12  ;;  %1863 = vmatprep.subr.bf16.mxu1 %v1862_v16  ;;  %v1938_v37 = vpack.c.bf16 %v683_v35, %v682_v34  ;;  %v185_v38 = vld [vmem:[#allocation10 + $0xe0] sm:$0xff]  ;;  %v186_v39 = vld [vmem:[#allocation10 + $0xe8] sm:$0xff]  ;;  %v187_v44 = vld [vmem:[#allocation10 + $0xf0] sm:$0xff] }
  0x63   :  { %1927 = vmatprep.subr.bf16.mxu0 %v1926_v17  ;;  %1726 = vmatprep.mubr.f32.mxu0 %v639_v29  ;;  %v684_v40 = vld [vmem:[#allocation10 + $0x160] sm:$0xff]  ;;  %v685_v41 = vld [vmem:[#allocation10 + $0x168] sm:$0xff]  ;;  %v1878_v42 = vpack.c.bf16 %v186_v39, %v185_v38  ;;  %v188_v45 = vld [vmem:[#allocation10 + $0xf8] sm:$0xff] }
  0x64   :  { %v1942_v43 = vpack.c.bf16 %v685_v41, %v684_v40  ;;  %v686_v46 = vld [vmem:[#allocation10 + $0x170] sm:$0xff]  ;;  %v687_v47 = vld [vmem:[#allocation10 + $0x178] sm:$0xff]  ;;  %v1882_v48 = vpack.c.bf16 %v188_v45, %v187_v44  ;;  %v124_v50 = vld [vmem:[#allocation10] sm:$0xff] }
  0x65   :  { %1865 = vmatpush3.bf16.msra.mxu1 %v1862_v16  ;;  %v1946_v49 = vpack.c.bf16 %v687_v47, %v686_v46  ;;  %v125_v51 = vld [vmem:[#allocation10 + $0x8] sm:$0xff]  ;;  %v978_v52 = vld [vmem:[#allocation10 + $0x180] sm:$0xff]  ;;  %v126_v56 = vld [vmem:[#allocation10 + $0x10] sm:$0xff] }
  0x66   :  { %1929 = vmatpush3.bf16.msra.mxu0 %v1926_v17  ;;  %1867 = vmatprep.subr.bf16.mxu1 %v1866_v22  ;;  %v979_v53 = vld [vmem:[#allocation10 + $0x188] sm:$0xff]  ;;  %v1886_v54 = vpack.c.bf16 %v125_v51, %v124_v50  ;;  %v127_v57 = vld [vmem:[#allocation10 + $0x18] sm:$0xff]  ;;  %v980_v59 = vld [vmem:[#allocation10 + $0x190] sm:$0xff] }
  0x67   :  { %1931 = vmatprep.subr.bf16.mxu0 %v1930_v23  ;;  %v1950_v55 = vpack.c.bf16 %v979_v53, %v978_v52  ;;  %v141_v58 = vld [vmem:[#allocation5 + $0x8] sm:$0xff]  ;;  %v981_v60 = vld [vmem:[#allocation10 + $0x198] sm:$0xff]  ;;  %v142_v62 = vld [vmem:[#allocation5 + $0x10] sm:$0xff]  ;;  %v1890_v63 = vpack.c.bf16 %v127_v57, %v126_v56 }
  0x68   :  { %v640_v61 = vld [vmem:[#allocation7 + $0x8] sm:$0xff]  ;;  %v641_v0 = vld [vmem:[#allocation7 + $0x10] sm:$0xff]  ;;  %v1954_v1 = vpack.c.bf16 %v981_v60, %v980_v59  ;;  %v128_v2 = vld [vmem:[#allocation10 + $0x20] sm:$0xff] }
  0x69   :  { %1869 = vmatpush3.bf16.msra.mxu1 %v1866_v22  ;;  %v129_v3 = vld [vmem:[#allocation10 + $0x28] sm:$0xff]  ;;  %v143_v4 = vld [vmem:[#allocation5 + $0x18] sm:$0xff]  ;;  %v982_v5 = vld [vmem:[#allocation10 + $0x1a0] sm:$0xff] }
  0x6a   :  { %1933 = vmatpush3.bf16.msra.mxu0 %v1930_v23  ;;  %1871 = vmatprep.subr.bf16.mxu1 %v1870_v30  ;;  %v983_v6 = vld [vmem:[#allocation10 + $0x1a8] sm:$0xff]  ;;  %v642_v7 = vld [vmem:[#allocation7 + $0x18] sm:$0xff]  ;;  %v144_v8 = vld [vmem:[#allocation5 + $0x20] sm:$0xff]  ;;  %v1894_v10 = vpack.c.bf16 %v129_v3, %v128_v2 }
  0x6b   :  { %1935 = vmatprep.subr.bf16.mxu0 %v1934_v31  ;;  %v643_v9 = vld [vmem:[#allocation7 + $0x20] sm:$0xff]  ;;  %v1958_v11 = vpack.c.bf16 %v983_v6, %v982_v5  ;;  %v130_v12 = vld [vmem:[#allocation10 + $0x30] sm:$0xff]  ;;  %v131_v13 = vld [vmem:[#allocation10 + $0x38] sm:$0xff] }
  0x6c   :  { %v145_v14 = vld [vmem:[#allocation5 + $0x28] sm:$0xff]  ;;  %v984_v15 = vld [vmem:[#allocation10 + $0x1b0] sm:$0xff]  ;;  %v985_v16 = vld [vmem:[#allocation10 + $0x1b8] sm:$0xff]  ;;  %v1898_v20 = vpack.c.bf16 %v131_v13, %v130_v12 }
  0x6d   :  { %1873 = vmatpush3.bf16.msra.mxu1 %v1870_v30  ;;  %v644_v17 = vld [vmem:[#allocation7 + $0x28] sm:$0xff]  ;;  %v146_v18 = vld [vmem:[#allocation5 + $0x30] sm:$0xff]  ;;  %v1962_v21 = vpack.c.bf16 %v985_v16, %v984_v15  ;;  %v132_v22 = vld [vmem:[#allocation10 + $0x40] sm:$0xff] }
  0x6e   :  { %1937 = vmatpush3.bf16.msra.mxu0 %v1934_v31  ;;  %1875 = vmatprep.subr.bf16.mxu1 %v1874_v36  ;;  %v645_v19 = vld [vmem:[#allocation7 + $0x30] sm:$0xff]  ;;  %v133_v23 = vld [vmem:[#allocation10 + $0x48] sm:$0xff]  ;;  %v147_v24 = vld [vmem:[#allocation5 + $0x38] sm:$0xff] }
  0x6f   :  { %1939 = vmatprep.subr.bf16.mxu0 %v1938_v37  ;;  %v986_v25 = vld [vmem:[#allocation10 + $0x1c0] sm:$0xff]  ;;  %v987_v26 = vld [vmem:[#allocation10 + $0x1c8] sm:$0xff]  ;;  %v646_v27 = vld [vmem:[#allocation7 + $0x38] sm:$0xff]  ;;  %v1902_v30 = vpack.c.bf16 %v133_v23, %v132_v22 }
  0x70   :  { %v148_v28 = vld [vmem:[#allocation5 + $0x40] sm:$0xff]  ;;  %v1966_v31 = vpack.c.bf16 %v987_v26, %v986_v25  ;;  %v134_v32 = vld [vmem:[#allocation10 + $0x50] sm:$0xff]  ;;  %v135_v33 = vld [vmem:[#allocation10 + $0x58] sm:$0xff] }
  0x71   :  { %1877 = vmatpush3.bf16.msra.mxu1 %v1874_v36  ;;  %v647_v29 = vld [vmem:[#allocation7 + $0x40] sm:$0xff]  ;;  %v149_v34 = vld [vmem:[#allocation5 + $0x48] sm:$0xff]  ;;  %v988_v35 = vld [vmem:[#allocation10 + $0x1d0] sm:$0xff]  ;;  %v1906_v40 = vpack.c.bf16 %v135_v33, %v134_v32 }
  0x72   :  { %1941 = vmatpush3.bf16.msra.mxu0 %v1938_v37  ;;  %1879 = vmatprep.subr.bf16.mxu1 %v1878_v42  ;;  %v989_v36 = vld [vmem:[#allocation10 + $0x1d8] sm:$0xff]  ;;  %v648_v37 = vld [vmem:[#allocation7 + $0x48] sm:$0xff]  ;;  %v150_v38 = vld [vmem:[#allocation5 + $0x50] sm:$0xff] }
  0x73   :  { %1943 = vmatprep.subr.bf16.mxu0 %v1942_v43  ;;  %v649_v39 = vld [vmem:[#allocation7 + $0x50] sm:$0xff]  ;;  %v1970_v41 = vpack.c.bf16 %v989_v36, %v988_v35  ;;  %v151_v44 = vld [vmem:[#allocation5 + $0x58] sm:$0xff]  ;;  %v990_v45 = vld [vmem:[#allocation10 + $0x1e0] sm:$0xff] }
  0x74   :  { %v991_v46 = vld [vmem:[#allocation10 + $0x1e8] sm:$0xff]  ;;  %v650_v47 = vld [vmem:[#allocation7 + $0x58] sm:$0xff]  ;;  %v138_v52 = vld [vmem:[#allocation10 + $0x70] sm:$0xff] }
  0x75   :  { %1881 = vmatpush3.bf16.msra.mxu1 %v1878_v42  ;;  %v136_v42 = vld [vmem:[#allocation10 + $0x60] sm:$0xff]  ;;  %v1974_v51 = vpack.c.bf16 %v991_v46, %v990_v45  ;;  %v139_v53 = vld [vmem:[#allocation10 + $0x78] sm:$0xff]  ;;  %v652_v57 = vld [vmem:[#allocation7 + $0x68] sm:$0xff] }
  0x76   :  { %1945 = vmatpush3.bf16.msra.mxu0 %v1942_v43  ;;  %1883 = vmatprep.subr.bf16.mxu1 %v1882_v48  ;;  %v137_v43 = vld [vmem:[#allocation10 + $0x68] sm:$0xff]  ;;  %v993_v56 = vld [vmem:[#allocation10 + $0x1f8] sm:$0xff]  ;;  %v653_v59 = vld [vmem:[#allocation7 + $0x70] sm:$0xff]  ;;  %v1914_v60 = vpack.c.bf16 %v139_v53, %v138_v52 }
  0x77   :  { %1947 = vmatprep.subr.bf16.mxu0 %v1946_v49  ;;  %v1910_v50 = vpack.c.bf16 %v137_v43, %v136_v42  ;;  %v157_v2 = vld [vmem:[#allocation5 + $0x88] sm:$0xff]  ;;  %v657_v5 = vld [vmem:[#allocation7 + $0x90] sm:$0xff]  ;;  %v159_v6 = vld [vmem:[#allocation5 + $0x98] sm:$0xff] }
  0x78   :  { %v656_v3 = vld [vmem:[#allocation7 + $0x88] sm:$0xff]  ;;  %v162_v12 = vld [vmem:[#allocation5 + $0xb0] sm:$0xff]  ;;  %v662_v15 = vld [vmem:[#allocation7 + $0xb8] sm:$0xff] }
  0x79   :  { %1885 = vmatpush3.bf16.msra.mxu1 %v1882_v48  ;;  %v152_v48 = vld [vmem:[#allocation5 + $0x60] sm:$0xff]  ;;  %v661_v13 = vld [vmem:[#allocation7 + $0xb0] sm:$0xff]  ;;  %v167_v22 = vld [vmem:[#allocation5 + $0xd8] sm:$0xff] }
  0x7a   :  { %1949 = vmatpush3.bf16.msra.mxu0 %v1946_v49  ;;  %1887 = vmatprep.subr.bf16.mxu1 %v1886_v54  ;;  %v651_v49 = vld [vmem:[#allocation7 + $0x60] sm:$0xff]  ;;  %v666_v23 = vld [vmem:[#allocation7 + $0xd8] sm:$0xff]  ;;  %v169_v26 = vld [vmem:[#allocation5 + $0xe8] sm:$0xff] }
  0x7b   :  { %1951 = vmatprep.subr.bf16.mxu0 %v1950_v55  ;;  %v164_v16 = vld [vmem:[#allocation5 + $0xc0] sm:$0xff]  ;;  %v946_v35 = vld [vmem:[#allocation8 + $0x8] sm:$0xff]  ;;  %v94_v36 = vld [vmem:[#allocation2 + $0x10] sm:$0xff] }
  0x7c   :  { %1567 = vmatmul.mubr.f32.vlgmr.msra.gmra.mrb[0].mxu1 %v141_v58  ;;  %v154_v58 = vld [vmem:[#allocation5 + $0x70] sm:$0xff]  ;;  %v667_v25 = vld [vmem:[#allocation7 + $0xe0] sm:$0xff]  ;;  %v97_v42 = vld [vmem:[#allocation2 + $0x28] sm:$0xff] }
  0x7d   :  { %1727 = vmatmul.mubr.f32.vlgmr.msra.gmra.mrb[0].mxu0 %v640_v61  ;;  %1889 = vmatpush3.bf16.msra.mxu1 %v1886_v54  ;;  %v153_v54 = vld [vmem:[#allocation5 + $0x68] sm:$0xff]  ;;  %v92_v32 = vld [vmem:[#allocation2] sm:$0xff]  ;;  %v951_v45 = vld [vmem:[#allocation8 + $0x30] sm:$0xff] }
  0x7e   :  { %1953 = vmatpush3.bf16.msra.mxu0 %v1950_v55  ;;  %1569 = vmatprep.mubr.f32.mxu1 %v142_v62  ;;  %v992_v55 = vld [vmem:[#allocation10 + $0x1f0] sm:$0xff]  ;;  %v155_v62 = vld [vmem:[#allocation5 + $0x78] sm:$0xff]  ;;  %v945_v33 = vld [vmem:[#allocation8] sm:$0xff] }
  0x7f   :  { %1729 = vmatprep.mubr.f32.mxu0 %v641_v0  ;;  %1891 = vmatprep.subr.bf16.mxu1 %v1890_v63  ;;  %v1978_v61 = vpack.c.bf16 %v993_v56, %v992_v55  ;;  %v156_v0 = vld [vmem:[#allocation5 + $0x80] sm:$0xff]  ;;  %v950_v43 = vld [vmem:[#allocation8 + $0x28] sm:$0xff]  ;;  %v99_v46 = vld [vmem:[#allocation2 + $0x38] sm:$0xff] }
  0x80   :  { %1570 = vmatmul.mubr.f32.gmra.mrb[2].mxu1 %v143_v4  ;;  %1955 = vmatprep.subr.bf16.mxu0 %v1954_v1  ;;  %v158_v4 = vld [vmem:[#allocation5 + $0x90] sm:$0xff]  ;;  %v956_v55 = vld [vmem:[#allocation8 + $0x58] sm:$0xff]  ;;  %v104_v56 = vld [vmem:[#allocation2 + $0x60] sm:$0xff] }
  0x81   :  { %1730 = vmatmul.mubr.f32.gmra.mrb[2].mxu0 %v642_v7  ;;  %1572 = vmatprep.mubr.f32.mxu1 %v144_v8  ;;  %v658_v7 = vld [vmem:[#allocation7 + $0x98] sm:$0xff]  ;;  %v160_v8 = vld [vmem:[#allocation5 + $0xa0] sm:$0xff]  ;;  %v102_v52 = vld [vmem:[#allocation2 + $0x50] sm:$0xff] }
  0x82   :  { %1732 = vmatprep.mubr.f32.mxu0 %v643_v9  ;;  %1893 = vmatpush3.bf16.msra.mxu1 %v1890_v63  ;;  %v654_v63 = vld [vmem:[#allocation7 + $0x78] sm:$0xff]  ;;  %v659_v9 = vld [vmem:[#allocation7 + $0xa0] sm:$0xff]  ;;  %v955_v53 = vld [vmem:[#allocation8 + $0x50] sm:$0xff] }
  0x83   :  { %1957 = vmatpush3.bf16.msra.mxu0 %v1954_v1  ;;  %1895 = vmatprep.subr.bf16.mxu1 %v1894_v10  ;;  %v655_v1 = vld [vmem:[#allocation7 + $0x80] sm:$0xff] }
  0x84   :  { %1573 = vmatmul.mubr.f32.gmra.mrb[4].mxu1 %v145_v14  ;;  %1959 = vmatprep.subr.bf16.mxu0 %v1958_v11  ;;  %v163_v14 = vld [vmem:[#allocation5 + $0xb8] sm:$0xff] }
  0x85   :  { %1733 = vmatmul.mubr.f32.gmra.mrb[4].mxu0 %v644_v17  ;;  %1575 = vmatprep.mubr.f32.mxu1 %v146_v18  ;;  %v663_v17 = vld [vmem:[#allocation7 + $0xc0] sm:$0xff]  ;;  %v165_v18 = vld [vmem:[#allocation5 + $0xc8] sm:$0xff] }
  0x86   :  { %1735 = vmatprep.mubr.f32.mxu0 %v645_v19  ;;  %1897 = vmatpush3.bf16.msra.mxu1 %v1894_v10  ;;  %v161_v10 = vld [vmem:[#allocation5 + $0xa8] sm:$0xff] }
  0x87   :  { %1961 = vmatpush3.bf16.msra.mxu0 %v1958_v11  ;;  %1899 = vmatprep.subr.bf16.mxu1 %v1898_v20  ;;  %v660_v11 = vld [vmem:[#allocation7 + $0xa8] sm:$0xff] }
  0x88   :  { %1576 = vmatmul.mubr.f32.gmra.mrb[6].mxu1 %v147_v24  ;;  %1963 = vmatprep.subr.bf16.mxu0 %v1962_v21  ;;  %v664_v19 = vld [vmem:[#allocation7 + $0xc8] sm:$0xff]  ;;  %v168_v24 = vld [vmem:[#allocation5 + $0xe0] sm:$0xff] }
  0x89   :  { %1736 = vmatmul.mubr.f32.gmra.mrb[6].mxu0 %v646_v27  ;;  %1578 = vmatprep.mubr.f32.mxu1 %v148_v28  ;;  %v668_v27 = vld [vmem:[#allocation7 + $0xe8] sm:$0xff]  ;;  %v170_v28 = vld [vmem:[#allocation5 + $0xf0] sm:$0xff] }
  0x8a   :  { %1738 = vmatprep.mubr.f32.mxu0 %v647_v29  ;;  %1901 = vmatpush3.bf16.msra.mxu1 %v1898_v20  ;;  %v166_v20 = vld [vmem:[#allocation5 + $0xd0] sm:$0xff] }
  0x8b   :  { %1965 = vmatpush3.bf16.msra.mxu0 %v1962_v21  ;;  %1903 = vmatprep.subr.bf16.mxu1 %v1902_v30  ;;  %v665_v21 = vld [vmem:[#allocation7 + $0xd0] sm:$0xff] }
  0x8c   :  { %1579 = vmatmul.mubr.f32.gmra.mrb[8].mxu1 %v149_v34  ;;  %1967 = vmatprep.subr.bf16.mxu0 %v1966_v31  ;;  %v669_v29 = vld [vmem:[#allocation7 + $0xf0] sm:$0xff]  ;;  %v93_v34 = vld [vmem:[#allocation2 + $0x8] sm:$0xff] }
  0x8d   :  { %1739 = vmatmul.mubr.f32.gmra.mrb[8].mxu0 %v648_v37  ;;  %1581 = vmatprep.mubr.f32.mxu1 %v150_v38  ;;  %v947_v37 = vld [vmem:[#allocation8 + $0x10] sm:$0xff]  ;;  %v95_v38 = vld [vmem:[#allocation2 + $0x18] sm:$0xff] }
  0x8e   :  { %1741 = vmatprep.mubr.f32.mxu0 %v649_v39  ;;  %1905 = vmatpush3.bf16.msra.mxu1 %v1902_v30  ;;  %v171_v30 = vld [vmem:[#allocation5 + $0xf8] sm:$0xff] }
  0x8f   :  { %1969 = vmatpush3.bf16.msra.mxu0 %v1966_v31  ;;  %1907 = vmatprep.subr.bf16.mxu1 %v1906_v40  ;;  %v670_v31 = vld [vmem:[#allocation7 + $0xf8] sm:$0xff] }
  0x90   :  { %1582 = vmatmul.mubr.f32.gmra.mrb[10].mxu1 %v151_v44  ;;  %1971 = vmatprep.subr.bf16.mxu0 %v1970_v41  ;;  %v948_v39 = vld [vmem:[#allocation8 + $0x18] sm:$0xff]  ;;  %v98_v44 = vld [vmem:[#allocation2 + $0x30] sm:$0xff] }
  0x91   :  { %1742 = vmatmul.mubr.f32.gmra.mrb[10].mxu0 %v650_v47  ;;  %1584 = vmatprep.mubr.f32.mxu1 %v152_v48  ;;  %v952_v47 = vld [vmem:[#allocation8 + $0x38] sm:$0xff]  ;;  %v100_v48 = vld [vmem:[#allocation2 + $0x40] sm:$0xff] }
  0x92   :  { %1744 = vmatprep.mubr.f32.mxu0 %v651_v49  ;;  %1909 = vmatpush3.bf16.msra.mxu1 %v1906_v40  ;;  %v96_v40 = vld [vmem:[#allocation2 + $0x20] sm:$0xff] }
  0x93   :  { %1973 = vmatpush3.bf16.msra.mxu0 %v1970_v41  ;;  %1911 = vmatprep.subr.bf16.mxu1 %v1910_v50  ;;  %v949_v41 = vld [vmem:[#allocation8 + $0x20] sm:$0xff] }
  0x94   :  { %1585 = vmatmul.mubr.f32.gmra.mrb[12].mxu1 %v153_v54  ;;  %1975 = vmatprep.subr.bf16.mxu0 %v1974_v51  ;;  %v953_v49 = vld [vmem:[#allocation8 + $0x40] sm:$0xff]  ;;  %v103_v54 = vld [vmem:[#allocation2 + $0x58] sm:$0xff] }
  0x95   :  { %1745 = vmatmul.mubr.f32.gmra.mrb[12].mxu0 %v652_v57  ;;  %1587 = vmatprep.mubr.f32.mxu1 %v154_v58  ;;  %v957_v57 = vld [vmem:[#allocation8 + $0x60] sm:$0xff]  ;;  %v105_v58 = vld [vmem:[#allocation2 + $0x68] sm:$0xff] }
  0x96   :  { %1747 = vmatprep.mubr.f32.mxu0 %v653_v59  ;;  %1913 = vmatpush3.bf16.msra.mxu1 %v1910_v50  ;;  %v101_v50 = vld [vmem:[#allocation2 + $0x48] sm:$0xff] }
  0x97   :  { %1977 = vmatpush3.bf16.msra.mxu0 %v1974_v51  ;;  %1915 = vmatprep.subr.bf16.mxu1 %v1914_v60  ;;  %v954_v51 = vld [vmem:[#allocation8 + $0x48] sm:$0xff] }
  0x98   :  { %1588 = vmatmul.mubr.f32.gmra.mrb[14].mxu1 %v155_v62  ;;  %1979 = vmatprep.subr.bf16.mxu0 %v1978_v61  ;;  %v958_v59 = vld [vmem:[#allocation8 + $0x68] sm:$0xff]  ;;  %v107_v62 = vld [vmem:[#allocation2 + $0x78] sm:$0xff] }
  0x99   :  { %1748 = vmatmul.mubr.f32.gmra.mrb[14].mxu0 %v654_v63  ;;  %1590 = vmatprep.mubr.f32.mxu1 %v156_v0  ;;  %v960_v63 = vld [vmem:[#allocation8 + $0x78] sm:$0xff]  ;;  %v108_v0 = vld [vmem:[#allocation2 + $0x80] sm:$0xff] }
  0x9a   :  { %1750 = vmatprep.mubr.f32.mxu0 %v655_v1  ;;  %1917 = vmatpush3.bf16.msra.mxu1 %v1914_v60  ;;  %v106_v60 = vld [vmem:[#allocation2 + $0x70] sm:$0xff]  ;;  %v961_v1 = vld [vmem:[#allocation8 + $0x80] sm:$0xff] }
  0x9b   :  { %1981 = vmatpush3.bf16.msra.mxu0 %v1978_v61  ;;  %v959_v61 = vld [vmem:[#allocation8 + $0x70] sm:$0xff] }
  0x9c   :  { %1591 = vmatmul.mubr.f32.gmra.mrb[16].mxu1 %v157_v2  ;;  %v109_v2 = vld [vmem:[#allocation2 + $0x88] sm:$0xff] }
  0x9d   :  { %1751 = vmatmul.mubr.f32.gmra.mrb[16].mxu0 %v656_v3  ;;  %1593 = vmatprep.mubr.f32.mxu1 %v158_v4  ;;  %v962_v3 = vld [vmem:[#allocation8 + $0x88] sm:$0xff]  ;;  %v110_v4 = vld [vmem:[#allocation2 + $0x90] sm:$0xff] }
  0x9e   :  { %1753 = vmatprep.mubr.f32.mxu0 %v657_v5  ;;  %v963_v5 = vld [vmem:[#allocation8 + $0x90] sm:$0xff] }
  0xa0   :  { %1594 = vmatmul.mubr.f32.gmra.mrb[18].mxu1 %v159_v6  ;;  %v111_v6 = vld [vmem:[#allocation2 + $0x98] sm:$0xff] }
  0xa1   :  { %1754 = vmatmul.mubr.f32.gmra.mrb[18].mxu0 %v658_v7  ;;  %1596 = vmatprep.mubr.f32.mxu1 %v160_v8  ;;  %v964_v7 = vld [vmem:[#allocation8 + $0x98] sm:$0xff]  ;;  %v112_v8 = vld [vmem:[#allocation2 + $0xa0] sm:$0xff] }
  0xa2   :  { %1756 = vmatprep.mubr.f32.mxu0 %v659_v9  ;;  %v965_v9 = vld [vmem:[#allocation8 + $0xa0] sm:$0xff] }
  0xa4   :  { %1597 = vmatmul.mubr.f32.gmra.mrb[20].mxu1 %v161_v10  ;;  %v113_v10 = vld [vmem:[#allocation2 + $0xa8] sm:$0xff] }
  0xa5   :  { %1757 = vmatmul.mubr.f32.gmra.mrb[20].mxu0 %v660_v11  ;;  %1599 = vmatprep.mubr.f32.mxu1 %v162_v12  ;;  %v966_v11 = vld [vmem:[#allocation8 + $0xa8] sm:$0xff]  ;;  %v114_v12 = vld [vmem:[#allocation2 + $0xb0] sm:$0xff] }
  0xa6   :  { %1759 = vmatprep.mubr.f32.mxu0 %v661_v13  ;;  %v967_v13 = vld [vmem:[#allocation8 + $0xb0] sm:$0xff] }
  0xa8   :  { %1600 = vmatmul.mubr.f32.gmra.mrb[22].mxu1 %v163_v14  ;;  %v115_v14 = vld [vmem:[#allocation2 + $0xb8] sm:$0xff] }
  0xa9   :  { %1760 = vmatmul.mubr.f32.gmra.mrb[22].mxu0 %v662_v15  ;;  %1602 = vmatprep.mubr.f32.mxu1 %v164_v16  ;;  %v968_v15 = vld [vmem:[#allocation8 + $0xb8] sm:$0xff]  ;;  %v116_v16 = vld [vmem:[#allocation2 + $0xc0] sm:$0xff] }
  0xaa   :  { %1762 = vmatprep.mubr.f32.mxu0 %v663_v17  ;;  %v969_v17 = vld [vmem:[#allocation8 + $0xc0] sm:$0xff] }
  0xac   :  { %1603 = vmatmul.mubr.f32.gmra.mrb[24].mxu1 %v165_v18  ;;  %v117_v18 = vld [vmem:[#allocation2 + $0xc8] sm:$0xff] }
  0xad   :  { %1763 = vmatmul.mubr.f32.gmra.mrb[24].mxu0 %v664_v19  ;;  %1605 = vmatprep.mubr.f32.mxu1 %v166_v20  ;;  %v970_v19 = vld [vmem:[#allocation8 + $0xc8] sm:$0xff]  ;;  %v118_v20 = vld [vmem:[#allocation2 + $0xd0] sm:$0xff] }
  0xae   :  { %1765 = vmatprep.mubr.f32.mxu0 %v665_v21  ;;  %v971_v21 = vld [vmem:[#allocation8 + $0xd0] sm:$0xff] }
  0xb0   :  { %1606 = vmatmul.mubr.f32.gmra.mrb[26].mxu1 %v167_v22  ;;  %v119_v22 = vld [vmem:[#allocation2 + $0xd8] sm:$0xff] }
  0xb1   :  { %1766 = vmatmul.mubr.f32.gmra.mrb[26].mxu0 %v666_v23  ;;  %1608 = vmatprep.mubr.f32.mxu1 %v168_v24  ;;  %v972_v23 = vld [vmem:[#allocation8 + $0xd8] sm:$0xff]  ;;  %v120_v24 = vld [vmem:[#allocation2 + $0xe0] sm:$0xff] }
  0xb2   :  { %1768 = vmatprep.mubr.f32.mxu0 %v667_v25  ;;  %v973_v25 = vld [vmem:[#allocation8 + $0xe0] sm:$0xff] }
  0xb4   :  { %1609 = vmatmul.mubr.f32.gmra.mrb[28].mxu1 %v169_v26  ;;  %v121_v26 = vld [vmem:[#allocation2 + $0xe8] sm:$0xff] }
  0xb5   :  { %1769 = vmatmul.mubr.f32.gmra.mrb[28].mxu0 %v668_v27  ;;  %1611 = vmatprep.mubr.f32.mxu1 %v170_v28  ;;  %v974_v27 = vld [vmem:[#allocation8 + $0xe8] sm:$0xff]  ;;  %v122_v28 = vld [vmem:[#allocation2 + $0xf0] sm:$0xff] }
  0xb6   :  { %1771 = vmatprep.mubr.f32.mxu0 %v669_v29  ;;  %v975_v29 = vld [vmem:[#allocation8 + $0xf0] sm:$0xff] }
  0xb8   :  { %1612 = vmatmul.mubr.f32.gmra.mrb[30].mxu1 %v171_v30  ;;  %v123_v30 = vld [vmem:[#allocation2 + $0xf8] sm:$0xff] }
  0xb9   :  { %1772 = vmatmul.mubr.f32.gmra.mrb[30].mxu0 %v670_v31  ;;  %1646 = vmatprep.mubr.f32.mxu1 %v92_v32  ;;  %v976_v31 = vld [vmem:[#allocation8 + $0xf8] sm:$0xff] }
  0xba   :  { %1806 = vmatprep.mubr.f32.mxu0 %v945_v33 }
  0xbc   :  { %1647 = vmatmul.mubr.f32.vlgmr.msra.gmra.mrb[0].mxu1 %v93_v34  ;;  %v2361_v34 = vld [vmem:[%s2415_s5] ss:$0 sm:$0xff]  ;;  %s2233_s5 = smov [#allocation11]  }
  0xbd   :  { %1807 = vmatmul.mubr.f32.vlgmr.msra.gmra.mrb[0].mxu0 %v946_v35  ;;  %1649 = vmatprep.mubr.f32.mxu1 %v94_v36  ;;  %s1327_s3 = sshll.u32 %s2233_s5, 4  ;;  %s1328_s3 = int_to_ptr.vmem [resolvable:$true] %s1327_s3 }
  0xbe   :  { %1809 = vmatprep.mubr.f32.mxu0 %v947_v37  ;;  %s2196_s24 = scalar_lea.vmem %s1328_s3, 4096  ;;  %p2201_p13 = scmp.lt.s32.totalorder %s1328_s3, %s1328_s3 }
  0xbf   :  { %p2197_p12 = scmp.ne.s32.totalorder %s1328_s3, %s2196_s24  ;;  %p2202_p0 = scmp.lt.s32.totalorder %s2196_s24, %s2196_s24 }
  0xc0   :  { %1650 = vmatmul.mubr.f32.gmra.mrb[2].mxu1 %v95_v38 }
  0xc1   :  { %1810 = vmatmul.mubr.f32.gmra.mrb[2].mxu0 %v948_v39  ;;  %1652 = vmatprep.mubr.f32.mxu1 %v96_v40  ;;  %p2203_p1 = por %p2202_p0, %p2201_p13 }
  0xc2   :  { %1812 = vmatprep.mubr.f32.mxu0 %v949_v41 }
  0xc3   :  { %p2204_p2 = pnand %p2203_p1, %p2197_p12 }
  0xc4   :  { %1653 = vmatmul.mubr.f32.gmra.mrb[4].mxu1 %v97_v42 }
  0xc5   :  { %1813 = vmatmul.mubr.f32.gmra.mrb[4].mxu0 %v950_v43  ;;  %1655 = vmatprep.mubr.f32.mxu1 %v98_v44 }
  0xc6   :  { %1815 = vmatprep.mubr.f32.mxu0 %v951_v45 }
  0xc8   :  { %1656 = vmatmul.mubr.f32.gmra.mrb[6].mxu1 %v99_v46 }
  0xc9   :  { %1816 = vmatmul.mubr.f32.gmra.mrb[6].mxu0 %v952_v47  ;;  %1658 = vmatprep.mubr.f32.mxu1 %v100_v48 }
  0xca   :  { %1818 = vmatprep.mubr.f32.mxu0 %v953_v49 }
  0xcc   :  { %1659 = vmatmul.mubr.f32.gmra.mrb[8].mxu1 %v101_v50 }
  0xcd   :  { %1819 = vmatmul.mubr.f32.gmra.mrb[8].mxu0 %v954_v51  ;;  %1661 = vmatprep.mubr.f32.mxu1 %v102_v52 }
  0xce   :  { %1821 = vmatprep.mubr.f32.mxu0 %v955_v53 }
  0xd0   :  { %1662 = vmatmul.mubr.f32.gmra.mrb[10].mxu1 %v103_v54 }
  0xd1   :  { %1822 = vmatmul.mubr.f32.gmra.mrb[10].mxu0 %v956_v55  ;;  %1664 = vmatprep.mubr.f32.mxu1 %v104_v56 }
  0xd2   :  { %1824 = vmatprep.mubr.f32.mxu0 %v957_v57 }
  0xd4   :  { %1665 = vmatmul.mubr.f32.gmra.mrb[12].mxu1 %v105_v58 }
  0xd5   :  { %1825 = vmatmul.mubr.f32.gmra.mrb[12].mxu0 %v958_v59  ;;  %1667 = vmatprep.mubr.f32.mxu1 %v106_v60 }
  0xd6   :  { %1827 = vmatprep.mubr.f32.mxu0 %v959_v61 }
  0xd8   :  { %1668 = vmatmul.mubr.f32.gmra.mrb[14].mxu1 %v107_v62 }
  0xd9   :  { %1828 = vmatmul.mubr.f32.gmra.mrb[14].mxu0 %v960_v63  ;;  %1670 = vmatprep.mubr.f32.mxu1 %v108_v0 }
  0xda   :  { %1830 = vmatprep.mubr.f32.mxu0 %v961_v1 }
  0xdc   :  { %1671 = vmatmul.mubr.f32.gmra.mrb[16].mxu1 %v109_v2 }
  0xdd   :  { %1831 = vmatmul.mubr.f32.gmra.mrb[16].mxu0 %v962_v3  ;;  %1673 = vmatprep.mubr.f32.mxu1 %v110_v4 }
  0xde   :  { %1833 = vmatprep.mubr.f32.mxu0 %v963_v5 }
  0xe0   :  { %1674 = vmatmul.mubr.f32.gmra.mrb[18].mxu1 %v111_v6 }
  0xe1   :  { %1834 = vmatmul.mubr.f32.gmra.mrb[18].mxu0 %v964_v7  ;;  %1676 = vmatprep.mubr.f32.mxu1 %v112_v8 }
  0xe2   :  { %1836 = vmatprep.mubr.f32.mxu0 %v965_v9 }
  0xe4   :  { %1677 = vmatmul.mubr.f32.gmra.mrb[20].mxu1 %v113_v10 }
  0xe5   :  { %1837 = vmatmul.mubr.f32.gmra.mrb[20].mxu0 %v966_v11  ;;  %1679 = vmatprep.mubr.f32.mxu1 %v114_v12 }
  0xe6   :  { %1839 = vmatprep.mubr.f32.mxu0 %v967_v13 }
  0xe8   :  { %1680 = vmatmul.mubr.f32.gmra.mrb[22].mxu1 %v115_v14 }
  0xe9   :  { %1840 = vmatmul.mubr.f32.gmra.mrb[22].mxu0 %v968_v15  ;;  %1682 = vmatprep.mubr.f32.mxu1 %v116_v16 }
  0xea   :  { %1842 = vmatprep.mubr.f32.mxu0 %v969_v17 }
  0xec   :  { %1683 = vmatmul.mubr.f32.gmra.mrb[24].mxu1 %v117_v18 }
  0xed   :  { %1843 = vmatmul.mubr.f32.gmra.mrb[24].mxu0 %v970_v19  ;;  %1685 = vmatprep.mubr.f32.mxu1 %v118_v20 }
  0xee   :  { %1845 = vmatprep.mubr.f32.mxu0 %v971_v21 }
  0xf0   :  { %1686 = vmatmul.mubr.f32.gmra.mrb[26].mxu1 %v119_v22 }
  0xf1   :  { %1846 = vmatmul.mubr.f32.gmra.mrb[26].mxu0 %v972_v23  ;;  %1688 = vmatprep.mubr.f32.mxu1 %v120_v24 }
  0xf2   :  { %1848 = vmatprep.mubr.f32.mxu0 %v973_v25 }
  0xf4   :  { %1689 = vmatmul.mubr.f32.gmra.mrb[28].mxu1 %v121_v26 }
  0xf5   :  { %1849 = vmatmul.mubr.f32.gmra.mrb[28].mxu0 %v974_v27  ;;  %1691 = vmatprep.mubr.f32.mxu1 %v122_v28 }
  0xf6   :  { %1851 = vmatprep.mubr.f32.mxu0 %v975_v29 }
  0xf8   :  { %1692 = vmatmul.mubr.f32.gmra.mrb[30].mxu1 %v123_v30 }
  0xf9   :  { %1852 = vmatmul.mubr.f32.gmra.mrb[30].mxu0 %v976_v31 }
 0x18f   :  { %v1648_v32 = vpop.f32.mrb[0].mxu1 }
 0x190   :  { %v1808_v33 = vpop.f32.mrb[0].mxu0  ;;  %v480_v35 = vpop.f32.mrb[1].mxu1 }
 0x191   :  { %v1982_v36 = vadd.f32 %v1808_v33, %v1648_v32  ;;  %v1060_v37 = vpop.f32.mrb[1].mxu0 }
 0x192   :  { %v1983_v38 = vadd.f32 %v1060_v37, %v480_v35 }
 0x193   :  { %v1259_v39 = vadd.f32 %v1982_v36, %v2361_v34  ;;  %v1651_v40 = vpop.f32.mrb[2].mxu1 }
 0x194   :  { %v1258_v41 = vadd.f32 %v1983_v38, %v2361_v34  ;;  %v1811_v42 = vpop.f32.mrb[2].mxu0  ;;  %v490_v43 = vpop.f32.mrb[3].mxu1 }
 0x195   :  { %1291 = vst [vmem:[#allocation11 + $0x8] sm:$0xff] %v1259_v39  ;;  %v1984_v44 = vadd.f32 %v1811_v42, %v1651_v40  ;;  %v1070_v45 = vpop.f32.mrb[3].mxu0 }
 0x196   :  { %1290 = vst [vmem:[#allocation11] sm:$0xff] %v1258_v41  ;;  %v1985_v46 = vadd.f32 %v1070_v45, %v490_v43 }
 0x197   :  { %v1261_v47 = vadd.f32 %v1984_v44, %v2361_v34  ;;  %v1654_v48 = vpop.f32.mrb[4].mxu1 }
 0x198   :  { %v1260_v49 = vadd.f32 %v1985_v46, %v2361_v34  ;;  %v1814_v50 = vpop.f32.mrb[4].mxu0  ;;  %v500_v51 = vpop.f32.mrb[5].mxu1 }
 0x199   :  { %1293 = vst [vmem:[#allocation11 + $0x18] sm:$0xff] %v1261_v47  ;;  %v1986_v52 = vadd.f32 %v1814_v50, %v1654_v48  ;;  %v1080_v53 = vpop.f32.mrb[5].mxu0 }
 0x19a   :  { %1292 = vst [vmem:[#allocation11 + $0x10] sm:$0xff] %v1260_v49  ;;  %v1987_v54 = vadd.f32 %v1080_v53, %v500_v51 }
 0x19b   :  { %v1263_v55 = vadd.f32 %v1986_v52, %v2361_v34  ;;  %v1657_v56 = vpop.f32.mrb[6].mxu1 }
 0x19c   :  { %v1262_v57 = vadd.f32 %v1987_v54, %v2361_v34  ;;  %v1817_v58 = vpop.f32.mrb[6].mxu0  ;;  %v510_v59 = vpop.f32.mrb[7].mxu1 }
 0x19d   :  { %1295 = vst [vmem:[#allocation11 + $0x28] sm:$0xff] %v1263_v55  ;;  %v1988_v60 = vadd.f32 %v1817_v58, %v1657_v56  ;;  %v1090_v61 = vpop.f32.mrb[7].mxu0 }
 0x19e   :  { %1294 = vst [vmem:[#allocation11 + $0x20] sm:$0xff] %v1262_v57  ;;  %v1989_v62 = vadd.f32 %v1090_v61, %v510_v59 }
 0x19f   :  { %v1265_v63 = vadd.f32 %v1988_v60, %v2361_v34  ;;  %v1660_v0 = vpop.f32.mrb[8].mxu1 }
 0x1a0   :  { %v1264_v1 = vadd.f32 %v1989_v62, %v2361_v34  ;;  %v1820_v2 = vpop.f32.mrb[8].mxu0  ;;  %v520_v3 = vpop.f32.mrb[9].mxu1 }
 0x1a1   :  { %1297 = vst [vmem:[#allocation11 + $0x38] sm:$0xff] %v1265_v63  ;;  %v1990_v4 = vadd.f32 %v1820_v2, %v1660_v0  ;;  %v1100_v5 = vpop.f32.mrb[9].mxu0 }
 0x1a2   :  { %1296 = vst [vmem:[#allocation11 + $0x30] sm:$0xff] %v1264_v1  ;;  %v1991_v6 = vadd.f32 %v1100_v5, %v520_v3 }
 0x1a3   :  { %v1267_v7 = vadd.f32 %v1990_v4, %v2361_v34  ;;  %v1663_v8 = vpop.f32.mrb[10].mxu1 }
 0x1a4   :  { %v1266_v9 = vadd.f32 %v1991_v6, %v2361_v34  ;;  %v1823_v10 = vpop.f32.mrb[10].mxu0  ;;  %v530_v11 = vpop.f32.mrb[11].mxu1 }
 0x1a5   :  { %1299 = vst [vmem:[#allocation11 + $0x48] sm:$0xff] %v1267_v7  ;;  %v1992_v12 = vadd.f32 %v1823_v10, %v1663_v8  ;;  %v1110_v13 = vpop.f32.mrb[11].mxu0 }
 0x1a6   :  { %1298 = vst [vmem:[#allocation11 + $0x40] sm:$0xff] %v1266_v9  ;;  %v1993_v14 = vadd.f32 %v1110_v13, %v530_v11 }
 0x1a7   :  { %v1269_v15 = vadd.f32 %v1992_v12, %v2361_v34  ;;  %v1666_v16 = vpop.f32.mrb[12].mxu1 }
 0x1a8   :  { %v1268_v17 = vadd.f32 %v1993_v14, %v2361_v34  ;;  %v1826_v18 = vpop.f32.mrb[12].mxu0  ;;  %v540_v19 = vpop.f32.mrb[13].mxu1 }
 0x1a9   :  { %1301 = vst [vmem:[#allocation11 + $0x58] sm:$0xff] %v1269_v15  ;;  %v1994_v20 = vadd.f32 %v1826_v18, %v1666_v16  ;;  %v1120_v21 = vpop.f32.mrb[13].mxu0 }
 0x1aa   :  { %1300 = vst [vmem:[#allocation11 + $0x50] sm:$0xff] %v1268_v17  ;;  %v1995_v22 = vadd.f32 %v1120_v21, %v540_v19 }
 0x1ab   :  { %v1271_v23 = vadd.f32 %v1994_v20, %v2361_v34  ;;  %v1669_v24 = vpop.f32.mrb[14].mxu1 }
 0x1ac   :  { %v1270_v25 = vadd.f32 %v1995_v22, %v2361_v34  ;;  %v1829_v26 = vpop.f32.mrb[14].mxu0  ;;  %v550_v27 = vpop.f32.mrb[15].mxu1 }
 0x1ad   :  { %1303 = vst [vmem:[#allocation11 + $0x68] sm:$0xff] %v1271_v23  ;;  %v1996_v28 = vadd.f32 %v1829_v26, %v1669_v24  ;;  %v1130_v29 = vpop.f32.mrb[15].mxu0 }
 0x1ae   :  { %1302 = vst [vmem:[#allocation11 + $0x60] sm:$0xff] %v1270_v25  ;;  %v1997_v30 = vadd.f32 %v1130_v29, %v550_v27 }
 0x1af   :  { %v1273_v31 = vadd.f32 %v1996_v28, %v2361_v34  ;;  %v1672_v32 = vpop.f32.mrb[16].mxu1 }
 0x1b0   :  { %v1272_v33 = vadd.f32 %v1997_v30, %v2361_v34  ;;  %v1832_v35 = vpop.f32.mrb[16].mxu0  ;;  %v560_v36 = vpop.f32.mrb[17].mxu1 }
 0x1b1   :  { %1305 = vst [vmem:[#allocation11 + $0x78] sm:$0xff] %v1273_v31  ;;  %v1998_v37 = vadd.f32 %v1832_v35, %v1672_v32  ;;  %v1140_v38 = vpop.f32.mrb[17].mxu0 }
 0x1b2   :  { %1304 = vst [vmem:[#allocation11 + $0x70] sm:$0xff] %v1272_v33  ;;  %v1999_v39 = vadd.f32 %v1140_v38, %v560_v36 }
 0x1b3   :  { %v1275_v40 = vadd.f32 %v1998_v37, %v2361_v34  ;;  %v1675_v41 = vpop.f32.mrb[18].mxu1 }
 0x1b4   :  { %v1274_v42 = vadd.f32 %v1999_v39, %v2361_v34  ;;  %v1835_v43 = vpop.f32.mrb[18].mxu0  ;;  %v570_v44 = vpop.f32.mrb[19].mxu1 }
 0x1b5   :  { %1307 = vst [vmem:[#allocation11 + $0x88] sm:$0xff] %v1275_v40  ;;  %v2000_v45 = vadd.f32 %v1835_v43, %v1675_v41  ;;  %v1150_v46 = vpop.f32.mrb[19].mxu0 }
 0x1b6   :  { %1306 = vst [vmem:[#allocation11 + $0x80] sm:$0xff] %v1274_v42  ;;  %v2001_v47 = vadd.f32 %v1150_v46, %v570_v44 }
 0x1b7   :  { %v1277_v48 = vadd.f32 %v2000_v45, %v2361_v34  ;;  %v1678_v49 = vpop.f32.mrb[20].mxu1 }
 0x1b8   :  { %v1276_v50 = vadd.f32 %v2001_v47, %v2361_v34  ;;  %v1838_v51 = vpop.f32.mrb[20].mxu0  ;;  %v580_v52 = vpop.f32.mrb[21].mxu1 }
 0x1b9   :  { %1309 = vst [vmem:[#allocation11 + $0x98] sm:$0xff] %v1277_v48  ;;  %v2002_v53 = vadd.f32 %v1838_v51, %v1678_v49  ;;  %v1160_v54 = vpop.f32.mrb[21].mxu0 }
 0x1ba   :  { %1308 = vst [vmem:[#allocation11 + $0x90] sm:$0xff] %v1276_v50  ;;  %v2003_v55 = vadd.f32 %v1160_v54, %v580_v52 }
 0x1bb   :  { %v1279_v56 = vadd.f32 %v2002_v53, %v2361_v34  ;;  %v1681_v57 = vpop.f32.mrb[22].mxu1 }
 0x1bc   :  { %v1278_v58 = vadd.f32 %v2003_v55, %v2361_v34  ;;  %v1841_v59 = vpop.f32.mrb[22].mxu0  ;;  %v590_v60 = vpop.f32.mrb[23].mxu1 }
 0x1bd   :  { %1311 = vst [vmem:[#allocation11 + $0xa8] sm:$0xff] %v1279_v56  ;;  %v2004_v61 = vadd.f32 %v1841_v59, %v1681_v57  ;;  %v1170_v62 = vpop.f32.mrb[23].mxu0 }
 0x1be   :  { %1310 = vst [vmem:[#allocation11 + $0xa0] sm:$0xff] %v1278_v58  ;;  %v2005_v63 = vadd.f32 %v1170_v62, %v590_v60 }
 0x1bf   :  { %v1281_v0 = vadd.f32 %v2004_v61, %v2361_v34  ;;  %v1684_v1 = vpop.f32.mrb[24].mxu1 }
 0x1c0   :  { %v1280_v2 = vadd.f32 %v2005_v63, %v2361_v34  ;;  %v1844_v3 = vpop.f32.mrb[24].mxu0  ;;  %v600_v4 = vpop.f32.mrb[25].mxu1 }
 0x1c1   :  { %1313 = vst [vmem:[#allocation11 + $0xb8] sm:$0xff] %v1281_v0  ;;  %v2006_v5 = vadd.f32 %v1844_v3, %v1684_v1  ;;  %v1180_v6 = vpop.f32.mrb[25].mxu0 }
 0x1c2   :  { %1312 = vst [vmem:[#allocation11 + $0xb0] sm:$0xff] %v1280_v2  ;;  %v2007_v7 = vadd.f32 %v1180_v6, %v600_v4 }
 0x1c3   :  { %v1283_v8 = vadd.f32 %v2006_v5, %v2361_v34  ;;  %v1687_v9 = vpop.f32.mrb[26].mxu1 }
 0x1c4   :  { %v1282_v10 = vadd.f32 %v2007_v7, %v2361_v34  ;;  %v1847_v11 = vpop.f32.mrb[26].mxu0  ;;  %v610_v12 = vpop.f32.mrb[27].mxu1 }
 0x1c5   :  { %1315 = vst [vmem:[#allocation11 + $0xc8] sm:$0xff] %v1283_v8  ;;  %v2008_v13 = vadd.f32 %v1847_v11, %v1687_v9  ;;  %v1190_v14 = vpop.f32.mrb[27].mxu0 }
 0x1c6   :  { %1314 = vst [vmem:[#allocation11 + $0xc0] sm:$0xff] %v1282_v10  ;;  %v2009_v15 = vadd.f32 %v1190_v14, %v610_v12 }
 0x1c7   :  { %v1285_v16 = vadd.f32 %v2008_v13, %v2361_v34  ;;  %v1690_v17 = vpop.f32.mrb[28].mxu1 }
 0x1c8   :  { %v1284_v18 = vadd.f32 %v2009_v15, %v2361_v34  ;;  %v1850_v19 = vpop.f32.mrb[28].mxu0  ;;  %v620_v20 = vpop.f32.mrb[29].mxu1 }
 0x1c9   :  { %1317 = vst [vmem:[#allocation11 + $0xd8] sm:$0xff] %v1285_v16  ;;  %v2010_v21 = vadd.f32 %v1850_v19, %v1690_v17  ;;  %v1200_v22 = vpop.f32.mrb[29].mxu0 }
 0x1ca   :  { %1316 = vst [vmem:[#allocation11 + $0xd0] sm:$0xff] %v1284_v18  ;;  %v2011_v23 = vadd.f32 %v1200_v22, %v620_v20 }
 0x1cb   :  { %v1287_v24 = vadd.f32 %v2010_v21, %v2361_v34  ;;  %v1693_v25 = vpop.f32.mrb[30].mxu1 }
 0x1cc   :  { %v1286_v26 = vadd.f32 %v2011_v23, %v2361_v34  ;;  %v1853_v27 = vpop.f32.mrb[30].mxu0  ;;  %v630_v28 = vpop.f32.mrb[31].mxu1 }
 0x1cd   :  { %1319 = vst [vmem:[#allocation11 + $0xe8] sm:$0xff] %v1287_v24  ;;  %v2012_v29 = vadd.f32 %v1853_v27, %v1693_v25  ;;  %v1210_v30 = vpop.f32.mrb[31].mxu0 }
 0x1ce   :  { %1318 = vst [vmem:[#allocation11 + $0xe0] sm:$0xff] %v1286_v26  ;;  %v2013_v31 = vadd.f32 %v1210_v30, %v630_v28 }
 0x1cf   :  { %v1289_v32 = vadd.f32 %v2012_v29, %v2361_v34 }
 0x1d0   :  { %v1288_v33 = vadd.f32 %v2013_v31, %v2361_v34 }
 0x1d1   :  { %1321 = vst [vmem:[#allocation11 + $0xf8] sm:$0xff] %v1289_v32 }
 0x1d2   :  { %1320 = vst [vmem:[#allocation11 + $0xf0] sm:$0xff] %v1288_v33 }
 0x1d3   :  { %2207 = shalt.err (!%p2204_p2)
}
 0x1d4   :  { %s2208_s14 = scalar_lea.hbm %s2416_s6, 4096 }
 0x1d5   :  { %p2209_p3 = scmp.ne.s32.totalorder %s2416_s6, %s2208_s14  ;;  %p2212_p4 = scmp.lt.u32.totalorder %s2208_s14, %s2416_s6 }
 0x1d7   :  { %p2214_p5 = pnand %p2212_p4, %p2209_p3 }
 0x1d9   :  { %2217 = shalt.err (!%p2214_p5)
}
 0x1da   :  { %1333 = dma.vmem_to_hbm [thread:$0]  %s1328_s3, 4096, %s2416_s6, [#allocation4], %s2228_s9, %s2228_s9, %s2229_s10  }
 0x1db   :  { %2224 = dma.done.wait [#allocation4], 4096  }
 0x1dc   :  { %2225 = vsyncadd [#allocation4], 4294963200 }
 0x1dd   :  { %1337 = vsyncpa [#allocation3], 1 }
 0x1de   :  { %1338 = vsyncpa [#allocation6], 1 }
 0x1df   :  { %1339 = vsyncpa [#allocation9], 1 }
 0x1e0   :  { %1340 = vsyncpa [#allocation4], 1 }

</bundles_post_ra>
